<compile_context>
chip_gen: v6e
topology: v6e:2x2x1
jax: 0.10.0
libtpu: 0.0.40
codegen_flags: <defaults>
</compile_context>

<pallas_src>
import jax
import jax.numpy as jnp
from jax.experimental import pallas as pl
from jax.experimental.pallas import tpu as pltpu


def _critic_kernel(xa_ref,
                   w1_ref, b1_ref,
                   w2_ref, b2_ref,
                   w3_ref, b3_ref,
                   w4_ref, b4_ref,
                   out_ref):
    """Feature-major MLP: every activation is (features, TB)."""
    # ---- fc1 (+ fused concat): (64, 12) @ (12, TB) -> (64, TB)
    xa = xa_ref[...].astype(w1_ref.dtype)                     # bf16 MXU input
    h1 = jnp.dot(w1_ref[...], xa, preferred_element_type=jnp.float32)
    h1 = jnp.maximum(h1 + b1_ref[...], 0.0)                   # f32 bias/ReLU

    # ---- fc2 + relu: (128, 64) @ (64, TB) -> (128, TB)
    h2 = jnp.dot(w2_ref[...], h1.astype(w2_ref.dtype),
                 preferred_element_type=jnp.float32)
    h2 = jnp.maximum(h2 + b2_ref[...], 0.0)

    # ---- fc3 + relu: (64, 128) @ (128, TB) -> (64, TB)  (no transpose needed)
    h3 = jnp.dot(w3_ref[...], h2.astype(w3_ref.dtype),
                 preferred_element_type=jnp.float32)
    h3 = jnp.maximum(h3 + b3_ref[...], 0.0)

    # ---- fc4: (1, 64) @ (64, TB) -> (1, TB) lane-dense Q row
    q = jnp.dot(w4_ref[...], h3.astype(w4_ref.dtype),
                preferred_element_type=jnp.float32)
    out_ref[...] = (q + b4_ref[...]).astype(out_ref.dtype)


def _pick_batch_tile(B, batch_tile):
    """Choose the batch-tile width TB.

    Small batches: a single full-array block (block dims == array dims, so no
    (8,128) divisibility constraint applies).  Larger batches: lane-multiple
    tiles capped at `batch_tile` and sized so the grid has >= 2 steps, letting
    the ("parallel",) axis feed both v7x TensorCores.
    """
    if B <= 256:
        return B
    half = -(-B // 2)                 # ceil(B / 2)
    tb = -(-half // 128) * 128        # round up to a multiple of 128 lanes
    return max(128, min(batch_tile, tb))


def critic_forward(x, a, params, *, batch_tile=2048):
    """x: [B, state_dim], a: [B, action_dim] -> q: [B, 1] (float32)."""
    B, state_dim = x.shape
    action_dim = a.shape[1]
    in_dim = state_dim + action_dim
    p = params
    H = p["w1"].shape[0]      # 64
    H2 = p["w2"].shape[0]     # 128

    # Pack x||a and go feature-major once, in the wrapper (48 B/sample).
    xa_t = jnp.concatenate([x, a], axis=1).T            # (in_dim, B) f32

    TB = _pick_batch_tile(B, batch_tile)
    grid = (pl.cdiv(B, TB),)

    def resident(arr):   # full-array block, constant index -> VMEM resident
        return pl.BlockSpec(arr.shape, lambda i, _nd=arr.ndim: (0,) * _nd)

    operands = (xa_t,
                p["w1"], p["b1"],
                p["w2"], p["b2"],
                p["w3"], p["b3"],
                p["w4"], p["b4"])
    in_specs = ([pl.BlockSpec((in_dim, TB), lambda i: (0, i))]
                + [resident(o) for o in operands[1:]])

    flops = 2 * B * (in_dim * H + H * H2 + H2 * H + H * 1)
    param_bytes = sum(int(o.size) * o.dtype.itemsize for o in operands[1:])
    bytes_accessed = in_dim * 4 * B + 4 * B + param_bytes

    q_row = pl.pallas_call(
        _critic_kernel,
        out_shape=jax.ShapeDtypeStruct((1, B), jnp.float32),
        grid=grid,
        in_specs=in_specs,
        out_specs=pl.BlockSpec((1, TB), lambda i: (0, i)),
        compiler_params=pltpu.CompilerParams(
            dimension_semantics=("parallel",),
            vmem_limit_bytes=32 * 1024 * 1024),
        cost_estimate=pl.CostEstimate(flops=flops,
                                      transcendentals=0,
                                      bytes_accessed=bytes_accessed),
    )(*operands)

    # (1, B) -> (B, 1): identical element order, free reshape.
    return q_row.reshape(B, 1)


def init_critic_params(key, state_dim, action_dim, hidden_dim=64,
                       matmul_dtype=jnp.bfloat16):
    """PyTorch-style uniform(-1/sqrt(fan_in), 1/sqrt(fan_in)) init.

    Kernel layout (feature-major, PyTorch [out, in] weight orientation):
      w1 [H, state+action]  w2 [2H, H]  w3 [H, 2H]  w4 [1, H]   (all bf16)
      b1 [H, 1]  b2 [2H, 1]  b3 [H, 1]  b4 [1, 1]               (column, f32)
    """
    def uniform(k, shape, fan_in):
        bound = float(fan_in) ** -0.5
        return jax.random.uniform(k, shape, jnp.float32, -bound, bound)

    ks = jax.random.split(key, 8)
    in1 = state_dim + action_dim
    H = hidden_dim

    return {
        "w1": uniform(ks[0], (H, in1), in1).astype(matmul_dtype),
        "b1": uniform(ks[1], (H, 1), in1),
        "w2": uniform(ks[2], (2 * H, H), H).astype(matmul_dtype),
        "b2": uniform(ks[3], (2 * H, 1), H),
        "w3": uniform(ks[4], (H, 2 * H), 2 * H).astype(matmul_dtype),
        "b3": uniform(ks[5], (H, 1), 2 * H),
        "w4": uniform(ks[6], (1, H), H).astype(matmul_dtype),
        "b4": uniform(ks[7], (1, 1), H),
    }


def critic_reference(x, a, p):
    """Plain-JAX reference mirroring the kernel's precision choices."""
    xa = jnp.concatenate([x, a], axis=1).astype(p["w1"].dtype)
    h1 = jnp.maximum(
        jnp.dot(xa, p["w1"].T, preferred_element_type=jnp.float32)
        + p["b1"].T, 0.0)
    h2 = jnp.maximum(
        jnp.dot(h1.astype(p["w2"].dtype), p["w2"].T,
                preferred_element_type=jnp.float32) + p["b2"].T, 0.0)
    h3 = jnp.maximum(
        jnp.dot(h2.astype(p["w3"].dtype), p["w3"].T,
                preferred_element_type=jnp.float32) + p["b3"].T, 0.0)
    return (jnp.dot(h3.astype(p["w4"].dtype), p["w4"].T,
                    preferred_element_type=jnp.float32) + p["b4"].T)  # (B, 1)


if __name__ == "__main__":
    key = jax.random.PRNGKey(0)
    kx, ka, kp = jax.random.split(key, 3)

    batch = 2
    state_dim = 8
    action_dim = 4
    hidden_dim = 64

    x = jax.random.normal(kx, (batch, state_dim), jnp.float32)
    a = jax.random.normal(ka, (batch, action_dim), jnp.float32)
    params = init_critic_params(kp, state_dim, action_dim, hidden_dim)

    q = jax.block_until_ready(critic_forward(x, a, params))
    q_ref = jax.block_until_ready(critic_reference(x, a, params))

    assert q.shape == (batch, 1), q.shape
    # Tolerance accounts for bf16 MXU inputs (mirrored in the reference) and
    # possible f32-accumulation differences between XLA and Mosaic.
    assert jnp.allclose(q, q_ref, atol=1e-2, rtol=1e-2), (q, q_ref)

    print("KERNEL_OK")
</pallas_src>

<mosaic_0001>
module attributes {stable_mosaic.version = 11 : i64} {
  func.func @_critic_kernel(%arg0: i32, %arg1: memref<12x2xf32, #tpu.memory_space<vmem>>, %arg2: memref<64x12xbf16, #tpu.memory_space<vmem>>, %arg3: memref<64x1xf32, #tpu.memory_space<vmem>>, %arg4: memref<128x64xbf16, #tpu.memory_space<vmem>>, %arg5: memref<128x1xf32, #tpu.memory_space<vmem>>, %arg6: memref<64x128xbf16, #tpu.memory_space<vmem>>, %arg7: memref<64x1xf32, #tpu.memory_space<vmem>>, %arg8: memref<1x64xbf16, #tpu.memory_space<vmem>>, %arg9: memref<1x1xf32, #tpu.memory_space<vmem>>, %arg10: memref<1x2xf32, #tpu.memory_space<vmem>>) attributes {dimension_semantics = [#tpu.dimension_semantics<parallel>], iteration_bounds = array<i64: 1>, scalar_prefetch = 0 : i64, scratch_operands = 0 : i64, tpu.core_type = #tpu.core_type<tc>, window_params = [{transform_indices = @transform_0, window_bounds = array<i64: 12, 2>}, {pipeline_mode = #tpu.pipeline_mode<synchronous>, transform_indices = @transform_1, window_bounds = array<i64: 64, 12>}, {pipeline_mode = #tpu.pipeline_mode<synchronous>, transform_indices = @transform_2, window_bounds = array<i64: 64, 1>}, {pipeline_mode = #tpu.pipeline_mode<synchronous>, transform_indices = @transform_3, window_bounds = array<i64: 128, 64>}, {pipeline_mode = #tpu.pipeline_mode<synchronous>, transform_indices = @transform_4, window_bounds = array<i64: 128, 1>}, {pipeline_mode = #tpu.pipeline_mode<synchronous>, transform_indices = @transform_5, window_bounds = array<i64: 64, 128>}, {pipeline_mode = #tpu.pipeline_mode<synchronous>, transform_indices = @transform_6, window_bounds = array<i64: 64, 1>}, {pipeline_mode = #tpu.pipeline_mode<synchronous>, transform_indices = @transform_7, window_bounds = array<i64: 1, 64>}, {pipeline_mode = #tpu.pipeline_mode<synchronous>, transform_indices = @transform_8, window_bounds = array<i64: 1, 1>}, {transform_indices = @transform_9, window_bounds = array<i64: 1, 2>}]} {
    %c0 = arith.constant 0 : index
    %c0_0 = arith.constant 0 : index
    %0 = vector.load %arg1[%c0, %c0_0] : memref<12x2xf32, #tpu.memory_space<vmem>>, vector<12x2xf32>
    %1 = arith.truncf %0 : vector<12x2xf32> to vector<12x2xbf16>
    %c0_1 = arith.constant 0 : index
    %c0_2 = arith.constant 0 : index
    %2 = vector.load %arg2[%c0_1, %c0_2] : memref<64x12xbf16, #tpu.memory_space<vmem>>, vector<64x12xbf16>
    %cst = arith.constant dense<0.000000e+00> : vector<64x2xf32>
    %3 = tpu.matmul %2, %1, %cst {dimension_numbers = #tpu.dot_dimension_numbers<[1], [0], [0], [1], [0, 0, 1, 1], [], []>} : vector<64x12xbf16>, vector<12x2xbf16>, vector<64x2xf32> -> vector<64x2xf32>
    %c0_3 = arith.constant 0 : index
    %c0_4 = arith.constant 0 : index
    %4 = vector.load %arg3[%c0_3, %c0_4] : memref<64x1xf32, #tpu.memory_space<vmem>>, vector<64x1xf32>
    %5 = vector.broadcast %4 : vector<64x1xf32> to vector<64x2xf32>
    %6 = arith.addf %3, %5 : vector<64x2xf32>
    %cst_5 = arith.constant 0.000000e+00 : f32
    %7 = vector.broadcast %cst_5 : f32 to vector<64x2xf32>
    %8 = arith.maximumf %6, %7 : vector<64x2xf32>
    %c0_6 = arith.constant 0 : index
    %c0_7 = arith.constant 0 : index
    %9 = vector.load %arg4[%c0_6, %c0_7] : memref<128x64xbf16, #tpu.memory_space<vmem>>, vector<128x64xbf16>
    %10 = arith.truncf %8 : vector<64x2xf32> to vector<64x2xbf16>
    %cst_8 = arith.constant dense<0.000000e+00> : vector<128x2xf32>
    %11 = tpu.matmul %9, %10, %cst_8 {dimension_numbers = #tpu.dot_dimension_numbers<[1], [0], [0], [1], [0, 0, 1, 1], [], []>} : vector<128x64xbf16>, vector<64x2xbf16>, vector<128x2xf32> -> vector<128x2xf32>
    %c0_9 = arith.constant 0 : index
    %c0_10 = arith.constant 0 : index
    %12 = vector.load %arg5[%c0_9, %c0_10] : memref<128x1xf32, #tpu.memory_space<vmem>>, vector<128x1xf32>
    %13 = vector.broadcast %12 : vector<128x1xf32> to vector<128x2xf32>
    %14 = arith.addf %11, %13 : vector<128x2xf32>
    %cst_11 = arith.constant 0.000000e+00 : f32
    %15 = vector.broadcast %cst_11 : f32 to vector<128x2xf32>
    %16 = arith.maximumf %14, %15 : vector<128x2xf32>
    %c0_12 = arith.constant 0 : index
    %c0_13 = arith.constant 0 : index
    %17 = vector.load %arg6[%c0_12, %c0_13] : memref<64x128xbf16, #tpu.memory_space<vmem>>, vector<64x128xbf16>
    %18 = arith.truncf %16 : vector<128x2xf32> to vector<128x2xbf16>
    %cst_14 = arith.constant dense<0.000000e+00> : vector<64x2xf32>
    %19 = tpu.matmul %17, %18, %cst_14 {dimension_numbers = #tpu.dot_dimension_numbers<[1], [0], [0], [1], [0, 0, 1, 1], [], []>} : vector<64x128xbf16>, vector<128x2xbf16>, vector<64x2xf32> -> vector<64x2xf32>
    %c0_15 = arith.constant 0 : index
    %c0_16 = arith.constant 0 : index
    %20 = vector.load %arg7[%c0_15, %c0_16] : memref<64x1xf32, #tpu.memory_space<vmem>>, vector<64x1xf32>
    %21 = vector.broadcast %20 : vector<64x1xf32> to vector<64x2xf32>
    %22 = arith.addf %19, %21 : vector<64x2xf32>
    %cst_17 = arith.constant 0.000000e+00 : f32
    %23 = vector.broadcast %cst_17 : f32 to vector<64x2xf32>
    %24 = arith.maximumf %22, %23 : vector<64x2xf32>
    %c0_18 = arith.constant 0 : index
    %c0_19 = arith.constant 0 : index
    %25 = vector.load %arg8[%c0_18, %c0_19] : memref<1x64xbf16, #tpu.memory_space<vmem>>, vector<1x64xbf16>
    %26 = arith.truncf %24 : vector<64x2xf32> to vector<64x2xbf16>
    %cst_20 = arith.constant dense<0.000000e+00> : vector<1x2xf32>
    %27 = tpu.matmul %25, %26, %cst_20 {dimension_numbers = #tpu.dot_dimension_numbers<[1], [0], [0], [1], [0, 0, 1, 1], [], []>} : vector<1x64xbf16>, vector<64x2xbf16>, vector<1x2xf32> -> vector<1x2xf32>
    %c0_21 = arith.constant 0 : index
    %c0_22 = arith.constant 0 : index
    %28 = vector.load %arg9[%c0_21, %c0_22] : memref<1x1xf32, #tpu.memory_space<vmem>>, vector<1x1xf32>
    %29 = vector.broadcast %28 : vector<1x1xf32> to vector<1x2xf32>
    %30 = arith.addf %27, %29 : vector<1x2xf32>
    %c0_23 = arith.constant 0 : index
    %c0_24 = arith.constant 0 : index
    %31 = vector.load %arg10[%c0_23, %c0_24] : memref<1x2xf32, #tpu.memory_space<vmem>>, vector<1x2xf32>
    tpu.vector_store %arg10[%c0_23, %c0_24], %30 {strides = array<i32>} : memref<1x2xf32, #tpu.memory_space<vmem>>, vector<1x2xf32>,
    return
  }
  func.func @transform_0(%arg0: i32) -> (i32, i32) {
    %c0_i32 = arith.constant 0 : i32
    %c0_i32_0 = arith.constant 0 : i32
    return %c0_i32, %arg0 : i32, i32
  }
  func.func @transform_1(%arg0: i32) -> (i32, i32) {
    %c0_i32 = arith.constant 0 : i32
    %c0_i32_0 = arith.constant 0 : i32
    %c0_i32_1 = arith.constant 0 : i32
    return %c0_i32, %c0_i32_0 : i32, i32
  }
  func.func @transform_2(%arg0: i32) -> (i32, i32) {
    %c0_i32 = arith.constant 0 : i32
    %c0_i32_0 = arith.constant 0 : i32
    %c0_i32_1 = arith.constant 0 : i32
    return %c0_i32, %c0_i32_0 : i32, i32
  }
  func.func @transform_3(%arg0: i32) -> (i32, i32) {
    %c0_i32 = arith.constant 0 : i32
    %c0_i32_0 = arith.constant 0 : i32
    %c0_i32_1 = arith.constant 0 : i32
    return %c0_i32, %c0_i32_0 : i32, i32
  }
  func.func @transform_4(%arg0: i32) -> (i32, i32) {
    %c0_i32 = arith.constant 0 : i32
    %c0_i32_0 = arith.constant 0 : i32
    %c0_i32_1 = arith.constant 0 : i32
    return %c0_i32, %c0_i32_0 : i32, i32
  }
  func.func @transform_5(%arg0: i32) -> (i32, i32) {
    %c0_i32 = arith.constant 0 : i32
    %c0_i32_0 = arith.constant 0 : i32
    %c0_i32_1 = arith.constant 0 : i32
    return %c0_i32, %c0_i32_0 : i32, i32
  }
  func.func @transform_6(%arg0: i32) -> (i32, i32) {
    %c0_i32 = arith.constant 0 : i32
    %c0_i32_0 = arith.constant 0 : i32
    %c0_i32_1 = arith.constant 0 : i32
    return %c0_i32, %c0_i32_0 : i32, i32
  }
  func.func @transform_7(%arg0: i32) -> (i32, i32) {
    %c0_i32 = arith.constant 0 : i32
    %c0_i32_0 = arith.constant 0 : i32
    %c0_i32_1 = arith.constant 0 : i32
    return %c0_i32, %c0_i32_0 : i32, i32
  }
  func.func @transform_8(%arg0: i32) -> (i32, i32) {
    %c0_i32 = arith.constant 0 : i32
    %c0_i32_0 = arith.constant 0 : i32
    %c0_i32_1 = arith.constant 0 : i32
    return %c0_i32, %c0_i32_0 : i32, i32
  }
  func.func @transform_9(%arg0: i32) -> (i32, i32) {
    %c0_i32 = arith.constant 0 : i32
    %c0_i32_0 = arith.constant 0 : i32
    return %c0_i32, %arg0 : i32, i32
  }
}

</mosaic_0001>

<bundles_post_ra>
// kernel: tpu_custom_call.1
= control target key start
LH: loop header
LB: loop body
LE: loop exit
PB: predicated region body
PF: predicated region fallthrough
CT: control target
= control target key end

     0   :  { %s1147_s0 = inlined_call_operand.vmem [shape: f32[12,2], index: 0, kind: input, shape index: {}]   ;;  %s1148_s1 = inlined_call_operand.vmem [shape: bf16[64,12], index: 1, kind: input, shape index: {}]   ;;  %s1149_s2 = inlined_call_operand.vmem [shape: f32[64,1], index: 2, kind: input, shape index: {}]   ;;  %s1150_s3 = inlined_call_operand.vmem [shape: bf16[128,64], index: 3, kind: input, shape index: {}]   ;;  %s1151_s4 = inlined_call_operand.vmem [shape: f32[128,1], index: 4, kind: input, shape index: {}]   ;;  %s1152_s5 = inlined_call_operand.vmem [shape: bf16[64,128], index: 5, kind: input, shape index: {}]   ;;  %s1153_s6 = inlined_call_operand.vmem [shape: f32[64,1], index: 6, kind: input, shape index: {}]   ;;  %s1154_s7 = inlined_call_operand.vmem [shape: bf16[1,64], index: 7, kind: input, shape index: {}]   ;;  %s1155_s8 = inlined_call_operand.<no memory space> [shape: f32[1,1], index: 8, kind: input, shape index: {}]   ;;  %s1156_s9 = inlined_call_operand.hbm [shape: f32[1,2], index: 9, kind: output, shape index: {}]  }
   0x1   :  { %v14_v0 = vstv %s1155_s8 }
   0x2   :  { %15 = vst [vmem:[#allocation2] sm:$0x1] %v14_v0 }
   0x3   :  { %v36_v1 = vld [vmem:[%s1147_s0] sm:$0xff]  ;;  %v37_v2 = vld [vmem:[%s1147_s0 + $0x8] sm:$0xf]  ;;  %vm128_vm0 = vcmask 1045504   ;;  %vm115_vm1 = vcmask 97280   ;;  %v876_v7 = vld [vmem:[%s1148_s1 + $0x10] sm:$0xff]  }
   0x4   :  { %v38_v3 = vpack.c.bf16 %v37_v2, %v36_v1  ;;  %v874_v4 = vld [vmem:[%s1148_s1] sm:$0xff]   ;;  %v875_v6 = vld [vmem:[%s1148_s1 + $0x8] sm:$0xff]   ;;  %v912_v8 = vmov 0   ;;  %v53_v9 = vld [vmem:[%s1149_s2 + $0x30] sm:$0xff] }
   0x5   :  { %799 = vmatprep.mubr.msk.bf16.mxu0 %vm115_vm1, %v874_v4  ;;  %872 = vset.pattern.permute.xlu0 %v912_v8  ;;  %v51_v10 = vld [vmem:[%s1149_s2 + $0x20] sm:$0xff]  ;;  %v54_v11 = vld [vmem:[%s1149_s2 + $0x38] sm:$0xff]  ;;  %v52_v12 = vld [vmem:[%s1149_s2 + $0x28] sm:$0xff] }
   0x6   :  { %867 = vmatprep.subr.msk.bf16.mxu0 %vm128_vm0, %v38_v3  ;;  %v130_v5 = vsel %vm128_vm0, %v38_v3, 0  ;;  %87 = vperm.xlu0 %872, %v53_v9   ;;  %v49_v13 = vld [vmem:[%s1149_s2 + $0x10] sm:$0xff]  ;;  %v877_v14 = vld [vmem:[%s1148_s1 + $0x18] sm:$0xff]   ;;  %v47_v16 = vld [vmem:[%s1149_s2] sm:$0xff] }
   0x7   :  { %798 = vmatpush3.bf16.msra.mxu0 %v130_v5  ;;  %873 = vset.pattern.permute.xlu1 %v912_v8  ;;  %v50_v15 = vld [vmem:[%s1149_s2 + $0x18] sm:$0xff]  ;;  %v48_v17 = vld [vmem:[%s1149_s2 + $0x8] sm:$0xff]  ;;  %v239_v18 = vld [vmem:[%s1151_s4 + $0x70] sm:$0xff] }
   0x8   :  { %77 = vperm.xlu1 %873, %v51_v10   ;;  %v240_v19 = vld [vmem:[%s1151_s4 + $0x78] sm:$0xff]  ;;  %v237_v20 = vld [vmem:[%s1151_s4 + $0x60] sm:$0xff]  ;;  %v238_v21 = vld [vmem:[%s1151_s4 + $0x68] sm:$0xff] }
   0xa   :  { %800 = vmatmul.mubr.msk.bf16.vlgmr.msra.gmra.mxu0 %vm115_vm1, %v875_v6  ;;  %92 = vperm.xlu0 %872, %v54_v11  }
   0xb   :  { %803 = vmatprep.mubr.msk.bf16.mxu0 %vm115_vm1, %v876_v7 }
   0xc   :  { %82 = vperm.xlu1 %873, %v52_v12  }
   0xe   :  { %67 = vperm.xlu0 %872, %v49_v13  }
  0x10   :  { %72 = vperm.xlu1 %873, %v50_v15  }
  0x12   :  { %804 = vmatmul.mubr.msk.bf16.gmra.mxu0 %vm115_vm1, %v877_v14  ;;  %57 = vperm.xlu0 %872, %v47_v16  }
  0x14   :  { %62 = vperm.xlu1 %873, %v48_v17  }
  0x16   :  { %313 = vperm.xlu0 %872, %v239_v18  }
  0x18   :  { %318 = vperm.xlu1 %873, %v240_v19  }
  0x19   :  { %16 = vsyncpa [#allocation4], 0  ;;  %v235_v22 = vld [vmem:[%s1151_s4 + $0x50] sm:$0xff]  ;;  %v236_v23 = vld [vmem:[%s1151_s4 + $0x58] sm:$0xff]  ;;  %vm361_vm2 = vcmask 523264   ;;  %vm914_vm3 = vmmov 0  }
  0x1a   :  { %303 = vperm.xlu0 %872, %v237_v20   ;;  %v233_v24 = vld [vmem:[%s1151_s4 + $0x40] sm:$0xff]  ;;  %v234_v25 = vld [vmem:[%s1151_s4 + $0x48] sm:$0xff]  ;;  %v231_v26 = vld [vmem:[%s1151_s4 + $0x30] sm:$0xff]  ;;  %s915_s10 = smov [#allocation3]   ;;  %vm718_vm4 = vcmask 8192  }
  0x1b   :  { %v232_v27 = vld [vmem:[%s1151_s4 + $0x38] sm:$0xff]  ;;  %v229_v28 = vld [vmem:[%s1151_s4 + $0x20] sm:$0xff]  ;;  %v230_v29 = vld [vmem:[%s1151_s4 + $0x28] sm:$0xff]  ;;  %s726_s11 = sshll.u32 %s915_s10, 4  ;;  %s727_s11 = int_to_ptr.vmem [resolvable:$true] %s726_s11 }
  0x1c   :  { %308 = vperm.xlu1 %873, %v238_v21   ;;  %v227_v30 = vld [vmem:[%s1151_s4 + $0x10] sm:$0xff]  ;;  %v228_v31 = vld [vmem:[%s1151_s4 + $0x18] sm:$0xff]  ;;  %v225_v32 = vld [vmem:[%s1151_s4] sm:$0xff]  ;;  %s890_s12 = scalar_lea.vmem %s727_s11, 16  ;;  %s894_s13 = scalar_lea.vmem %s727_s11, 32 }
  0x1d   :  { %v226_v33 = vld [vmem:[%s1151_s4 + $0x8] sm:$0xff]  ;;  %v521_v34 = vld [vmem:[%s1153_s6 + $0x30] sm:$0xff]  ;;  %v522_v35 = vld [vmem:[%s1153_s6 + $0x38] sm:$0xff]  ;;  %p891_p0 = scmp.ne.s32.totalorder %s727_s11, %s890_s12  ;;  %p895_p1 = scmp.lt.s32.totalorder %s727_s11, %s727_s11 }
  0x1e   :  { %293 = vperm.xlu0 %872, %v235_v22   ;;  %v519_v36 = vld [vmem:[%s1153_s6 + $0x20] sm:$0xff]  ;;  %v520_v37 = vld [vmem:[%s1153_s6 + $0x28] sm:$0xff]  ;;  %v517_v38 = vld [vmem:[%s1153_s6 + $0x10] sm:$0xff]  ;;  %p896_p2 = scmp.lt.s32.totalorder %s894_s13, %s890_s12 }
  0x1f   :  { %v518_v39 = vld [vmem:[%s1153_s6 + $0x18] sm:$0xff]  ;;  %v515_v40 = vld [vmem:[%s1153_s6] sm:$0xff]  ;;  %v516_v41 = vld [vmem:[%s1153_s6 + $0x8] sm:$0xff] }
  0x20   :  { %298 = vperm.xlu1 %873, %v236_v23   ;;  %v665_v42 = vld [vmem:[#allocation2] sm:$0x1]  ;;  %v879_v16 = vld [vmem:[%s1150_s3 + $0x8] sm:$0xff]   ;;  %v880_v17 = vld [vmem:[%s1150_s3 + $0x10] sm:$0xff]   ;;  %p897_p3 = por %p896_p2, %p895_p1 }
  0x21   :  { %v878_v43 = vld [vmem:[%s1150_s3] sm:$0xff]   ;;  %v881_v18 = vld [vmem:[%s1150_s3 + $0x18] sm:$0xff]   ;;  %v883_v20 = vld [vmem:[%s1150_s3 + $0x28] sm:$0xff]  }
  0x22   :  { %283 = vperm.xlu0 %872, %v233_v24   ;;  %815 = vmatprep.mubr.msk.bf16.mxu1 %vm361_vm2, %v878_v43  ;;  %v882_v19 = vld [vmem:[%s1150_s3 + $0x20] sm:$0xff]   ;;  %v884_v21 = vld [vmem:[%s1150_s3 + $0x30] sm:$0xff]   ;;  %v885_v22 = vld [vmem:[%s1150_s3 + $0x38] sm:$0xff]   ;;  %p898_p4 = pnand %p897_p3, %p891_p0 }
  0x23   :  { %v886_v23 = vld [vmem:[%s1152_s5] sm:$0xff]  }
  0x24   :  { %288 = vperm.xlu1 %873, %v234_v25   ;;  %847 = vmatprep.mubr.bf16.mxu0 %v886_v23 }
  0x26   :  { %273 = vperm.xlu0 %872, %v231_v26  }
  0x28   :  { %278 = vperm.xlu1 %873, %v232_v27  }
  0x2a   :  { %263 = vperm.xlu0 %872, %v229_v28  }
  0x2c   :  { %268 = vperm.xlu1 %873, %v230_v29  }
  0x2e   :  { %253 = vperm.xlu0 %872, %v227_v30  }
  0x30   :  { %258 = vperm.xlu1 %873, %v228_v31  }
  0x32   :  { %243 = vperm.xlu0 %872, %v225_v32  }
  0x34   :  { %248 = vperm.xlu1 %873, %v226_v33  }
  0x36   :  { %555 = vperm.xlu0 %872, %v521_v34  }
  0x38   :  { %560 = vperm.xlu1 %873, %v522_v35  }
  0x3a   :  { %545 = vperm.xlu0 %872, %v519_v36  }
  0x3c   :  { %550 = vperm.xlu1 %873, %v520_v37  }
  0x3e   :  { %535 = vperm.xlu0 %872, %v517_v38  }
  0x40   :  { %540 = vperm.xlu1 %873, %v518_v39  }
  0x42   :  { %525 = vperm.xlu0 %872, %v515_v40  }
  0x44   :  { %530 = vperm.xlu1 %873, %v516_v41  }
  0x46   :  { %668 = vperm.xlu0 %872, %v665_v42  }
  0x81   :  { %v88_v46 = vpop.permute.xlu0 %87 }
  0x83   :  { %v78_v44 = vpop.permute.xlu1 %77 }
  0x85   :  { %v93_v51 = vpop.permute.xlu0 %92 }
  0x87   :  { %v83_v49 = vpop.permute.xlu1 %82 }
  0x89   :  { %v68_v59 = vpop.permute.xlu0 %67 }
  0x8b   :  { %v73_v55 = vpop.permute.xlu1 %72 }
  0x8d   :  { %v58_v9 = vpop.permute.xlu0 %57 }
  0x8f   :  { %v63_v5 = vpop.permute.xlu1 %62 }
  0x91   :  { %v314_v30 = vpop.permute.xlu0 %313 }
  0x93   :  { %v319_v28 = vpop.permute.xlu1 %318 }
  0x95   :  { %v304_v35 = vpop.permute.xlu0 %303 }
  0x97   :  { %v309_v33 = vpop.permute.xlu1 %308 }
  0x99   :  { %v294_v40 = vpop.permute.xlu0 %293 }
  0x9b   :  { %v299_v38 = vpop.permute.xlu1 %298 }
  0x9f   :  { %v289_v43 = vpop.permute.xlu1 %288 }
  0xca   :  { %v801_v45 = vpop.f32.mrf.mxu0 }
  0xcb   :  { %v175_v1 = vadd.f32 %v801_v45, %v68_v59 }
  0xcc   :  { %v166_v47 = vpop.f32.mrf.mxu0 }
  0xcd   :  { %v199_v10 = vmax.f32 %v175_v1, 0.0  ;;  %v167_v11 = vadd.f32 %v166_v47, %v58_v9 }
  0xce   :  { %v802_v48 = vpop.f32.mrf.mxu0 }
  0xcf   :  { %v178_v61 = vadd.f32 %v802_v48, %v73_v55  ;;  %v197_v14 = vmax.f32 %v167_v11, 0.0  ;;  %v279_v55 = vpop.permute.xlu1 %278 }
  0xd0   :  { %v169_v50 = vpop.f32.mrf.mxu0 }
  0xd1   :  { %v200_v6 = vmax.f32 %v178_v61, 0.0  ;;  %v170_v7 = vadd.f32 %v169_v50, %v63_v5 }
  0xd2   :  { %v805_v52 = vpop.f32.mrf.mxu0 }
  0xd3   :  { %v191_v54 = vadd.f32 %v805_v52, %v88_v46  ;;  %v222_v12 = vpack.c.bf16 %v200_v6, %v199_v10  ;;  %v198_v13 = vmax.f32 %v170_v7, 0.0  ;;  %v284_v46 = vpop.permute.xlu0 %283 }
  0xd4   :  { %v182_v53 = vpop.f32.mrf.mxu0 }
  0xd5   :  { %v183_v57 = vadd.f32 %v182_v53, %v78_v44  ;;  %v203_v62 = vmax.f32 %v191_v54, 0.0  ;;  %v221_v15 = vpack.c.bf16 %v198_v13, %v197_v14 }
  0xd6   :  { %v806_v56 = vpop.f32.mrf.mxu0 }
  0xd7   :  { %v194_v58 = vadd.f32 %v806_v56, %v93_v51  ;;  %v201_v2 = vmax.f32 %v183_v57, 0.0 }
  0xd8   :  { %v185_v60 = vpop.f32.mrf.mxu0 }
  0xd9   :  { %v204_v63 = vmax.f32 %v194_v58, 0.0  ;;  %v186_v0 = vadd.f32 %v185_v60, %v83_v49  ;;  %v274_v60 = vpop.permute.xlu0 %273 }
  0xdb   :  { %v202_v3 = vmax.f32 %v186_v0, 0.0  ;;  %v224_v4 = vpack.c.bf16 %v204_v63, %v203_v62 }
  0xdd   :  { %v223_v8 = vpack.c.bf16 %v202_v3, %v201_v2  ;;  %807 = vmatprep.subr.bf16.mxu1 %v224_v4  ;;  %v269_v2 = vpop.permute.xlu1 %268  ;;  %v264_v6 = vpop.permute.xlu0 %263 }
  0xde   :  { %808 = vmatpush3.bf16.msra.mxu1 %v224_v4 }
  0xdf   :  { %809 = vmatprep.subr.bf16.mxu1 %v223_v8 }
  0xe2   :  { %810 = vmatpush3.bf16.msra.mxu1 %v223_v8 }
  0xe3   :  { %811 = vmatprep.subr.bf16.mxu1 %v222_v12 }
  0xe6   :  { %812 = vmatpush3.bf16.msra.mxu1 %v222_v12  ;;  %v259_v12 = vpop.permute.xlu1 %258 }
  0xe7   :  { %813 = vmatprep.subr.bf16.mxu1 %v221_v15 }
  0xea   :  { %814 = vmatpush3.bf16.msra.mxu1 %v221_v15  ;;  %v254_v15 = vpop.permute.xlu0 %253 }
  0xed   :  { %816 = vmatmul.mubr.msk.bf16.vlgmr.msra.gmra.mxu1 %vm361_vm2, %v879_v16 }
  0xee   :  { %819 = vmatprep.mubr.msk.bf16.mxu1 %vm361_vm2, %v880_v17 }
  0xf5   :  { %820 = vmatmul.mubr.msk.bf16.gmra.mxu1 %vm361_vm2, %v881_v18 }
  0xf6   :  { %823 = vmatprep.mubr.msk.bf16.mxu1 %vm361_vm2, %v882_v19 }
  0xfd   :  { %824 = vmatmul.mubr.msk.bf16.gmra.mxu1 %vm361_vm2, %v883_v20 }
  0xfe   :  { %827 = vmatprep.mubr.msk.bf16.mxu1 %vm361_vm2, %v884_v21  ;;  %v249_v21 = vpop.permute.xlu1 %248 }
 0x105   :  { %828 = vmatmul.mubr.msk.bf16.gmra.mxu1 %vm361_vm2, %v885_v22 }
 0x1ad   :  { %v1122_v24 = vpop.f32.mrf.mxu1 }
 0x1ae   :  { %v429_v19 = vadd.f32 %v1122_v24, %v254_v15  ;;  %v887_v24 = vld [vmem:[%s1152_s5 + $0x8] sm:$0xff]  }
 0x1af   :  { %v1124_v25 = vpop.f32.mrf.mxu1 }
 0x1b1   :  { %v818_v26 = vpop.f32.mrf.mxu1 }
 0x1b2   :  { %v432_v16 = vadd.f32 %v818_v26, %v259_v12 }
 0x1b3   :  { %v1126_v27 = vpop.f32.mrf.mxu1 }
 0x1b4   :  { %v486_v22 = vmax.f32 %v432_v16, 0.0  ;;  %v424_v23 = vadd.f32 %v1126_v27, %v249_v21  ;;  %v888_v27 = vld [vmem:[%s1152_s5 + $0x10] sm:$0xff]  }
 0x1b5   :  { %v821_v29 = vpop.f32.mrf.mxu1 }
 0x1b6   :  { %v445_v7 = vadd.f32 %v821_v29, %v274_v60  ;;  %v244_v29 = vpop.permute.xlu0 %243  ;;  %v484_v26 = vmax.f32 %v424_v23, 0.0 }
 0x1b7   :  { %v436_v31 = vpop.f32.mrf.mxu1 }
 0x1b8   :  { %v489_v13 = vmax.f32 %v445_v7, 0.0  ;;  %v437_v14 = vadd.f32 %v436_v31, %v264_v6  ;;  %v421_v31 = vadd.f32 %v1124_v25, %v244_v29  ;;  %v889_v25 = vld [vmem:[%s1152_s5 + $0x18] sm:$0xff]  }
 0x1b9   :  { %v822_v32 = vpop.f32.mrf.mxu1 }
 0x1ba   :  { %v448_v3 = vadd.f32 %v822_v32, %v279_v55  ;;  %v487_v20 = vmax.f32 %v437_v14, 0.0 }
 0x1bb   :  { %v439_v34 = vpop.f32.mrf.mxu1 }
 0x1bc   :  { %v490_v9 = vmax.f32 %v448_v3, 0.0  ;;  %v440_v10 = vadd.f32 %v439_v34, %v269_v2 }
 0x1bd   :  { %v825_v36 = vpop.f32.mrf.mxu1 }
 0x1be   :  { %v461_v56 = vadd.f32 %v825_v36, %v294_v40  ;;  %v510_v17 = vpack.c.bf16 %v490_v9, %v489_v13  ;;  %v488_v18 = vmax.f32 %v440_v10, 0.0  ;;  %v671_v9 = vlaneseq }
 0x1bf   :  { %v452_v37 = vpop.f32.mrf.mxu1 }
 0x1c0   :  { %v493_v0 = vmax.f32 %v461_v56, 0.0  ;;  %v453_v1 = vadd.f32 %v452_v37, %v284_v46  ;;  %v561_v37 = vpop.permute.xlu1 %560  ;;  %v672_v10 = vshrl.u32 %v671_v9, 7 }
 0x1c1   :  { %v826_v39 = vpop.f32.mrf.mxu1 }
 0x1c2   :  { %v464_v51 = vadd.f32 %v826_v39, %v299_v38  ;;  %v491_v8 = vmax.f32 %v453_v1, 0.0  ;;  %v556_v39 = vpop.permute.xlu0 %555 }
 0x1c3   :  { %v455_v41 = vpop.f32.mrf.mxu1 }
 0x1c4   :  { %v494_v61 = vmax.f32 %v464_v51, 0.0  ;;  %v456_v62 = vadd.f32 %v455_v41, %v289_v43 }
 0x1c5   :  { %v829_v42 = vpop.f32.mrf.mxu1 }
 0x1c6   :  { %v477_v45 = vadd.f32 %v829_v42, %v314_v30  ;;  %v512_v4 = vpack.c.bf16 %v494_v61, %v493_v0  ;;  %v492_v5 = vmax.f32 %v456_v62, 0.0  ;;  %v485_v30 = vmax.f32 %v429_v19, 0.0  ;;  %v551_v42 = vpop.permute.xlu1 %550 }
 0x1c7   :  { %v468_v44 = vpop.f32.mrf.mxu1 }
 0x1c8   :  { %v469_v48 = vadd.f32 %v468_v44, %v304_v35  ;;  %v497_v52 = vmax.f32 %v477_v45, 0.0  ;;  %v511_v11 = vpack.c.bf16 %v492_v5, %v491_v8  ;;  %v508_v32 = vpack.c.bf16 %v486_v22, %v485_v30  ;;  %v546_v44 = vpop.permute.xlu0 %545  ;;  %v660_v8 = vld [vmem:[%s1154_s7] sm:$0x1] }
 0x1c9   :  { %v830_v47 = vpop.f32.mrf.mxu1  ;;  %v913_v35 = vmov 0.0  }
 0x1ca   :  { %v480_v49 = vadd.f32 %v830_v47, %v319_v28  ;;  %v495_v57 = vmax.f32 %v469_v48, 0.0  ;;  %v509_v28 = vpack.c.bf16 %v488_v18, %v487_v20  ;;  %855 = vmatprep.subr.bf16.mxu1 %v913_v35  ;;  %863 = vmatprep.mubr.msk.bf16.mxu1 %vm914_vm3, %v913_v35 }
 0x1cb   :  { %v471_v50 = vpop.f32.mrf.mxu1 }
 0x1cc   :  { %v498_v53 = vmax.f32 %v480_v49, 0.0  ;;  %v472_v54 = vadd.f32 %v471_v50, %v309_v33  ;;  %v483_v33 = vmax.f32 %v421_v31, 0.0  ;;  %v541_v49 = vpop.permute.xlu1 %540  ;;  %v536_v55 = vpop.permute.xlu0 %535 }
 0x1ce   :  { %v514_v58 = vpack.c.bf16 %v498_v53, %v497_v52  ;;  %v496_v59 = vmax.f32 %v472_v54, 0.0  ;;  %v507_v34 = vpack.c.bf16 %v484_v26, %v483_v33 }
 0x1d0   :  { %v513_v63 = vpack.c.bf16 %v496_v59, %v495_v57  ;;  %831 = vmatprep.subr.bf16.mxu0 %v514_v58  ;;  %v531_v61 = vpop.permute.xlu1 %530  ;;  %v526_v1 = vpop.permute.xlu0 %525 }
 0x1d1   :  { %832 = vmatpush3.bf16.msra.mxu0 %v514_v58 }
 0x1d2   :  { %833 = vmatprep.subr.bf16.mxu0 %v513_v63 }
 0x1d4   :  { %v669_v12 = vpop.permute.xlu0 %668 }
 0x1d5   :  { %834 = vmatpush3.bf16.msra.mxu0 %v513_v63 }
 0x1d6   :  { %835 = vmatprep.subr.bf16.mxu0 %v512_v4 }
 0x1d9   :  { %836 = vmatpush3.bf16.msra.mxu0 %v512_v4 }
 0x1da   :  { %837 = vmatprep.subr.bf16.mxu0 %v511_v11 }
 0x1dd   :  { %838 = vmatpush3.bf16.msra.mxu0 %v511_v11  ;;  %v673_v11 = vsub.s32 0, %v672_v10 }
 0x1de   :  { %839 = vmatprep.subr.bf16.mxu0 %v510_v17 }
 0x1df   :  { %v674_v13 = vrot.slane %v669_v12, %v673_v11 }
 0x1e1   :  { %840 = vmatpush3.bf16.msra.mxu0 %v510_v17 }
 0x1e2   :  { %841 = vmatprep.subr.bf16.mxu0 %v509_v28 }
 0x1e5   :  { %842 = vmatpush3.bf16.msra.mxu0 %v509_v28 }
 0x1e6   :  { %843 = vmatprep.subr.bf16.mxu0 %v508_v32 }
 0x1e9   :  { %844 = vmatpush3.bf16.msra.mxu0 %v508_v32 }
 0x1ea   :  { %845 = vmatprep.subr.bf16.mxu0 %v507_v34 }
 0x1ed   :  { %846 = vmatpush3.bf16.msra.mxu0 %v507_v34 }
 0x1f0   :  { %848 = vmatmul.mubr.bf16.vlgmr.msra.gmra.mxu0 %v887_v24 }
 0x1f1   :  { %851 = vmatprep.mubr.bf16.mxu0 %v888_v27 }
 0x1f8   :  { %852 = vmatmul.mubr.bf16.gmra.mxu0 %v889_v25 }
 0x2b0   :  { %v849_v36 = vpop.f32.mrf.mxu0 }
 0x2b1   :  { %v630_v59 = vadd.f32 %v849_v36, %v536_v55 }
 0x2b2   :  { %v621_v38 = vpop.f32.mrf.mxu0 }
 0x2b3   :  { %v654_v2 = vmax.f32 %v630_v59, 0.0  ;;  %v622_v3 = vadd.f32 %v621_v38, %v526_v1 }
 0x2b4   :  { %v850_v40 = vpop.f32.mrf.mxu0 }
 0x2b5   :  { %v633_v56 = vadd.f32 %v850_v40, %v541_v49  ;;  %v652_v6 = vmax.f32 %v622_v3, 0.0 }
 0x2b6   :  { %v624_v41 = vpop.f32.mrf.mxu0 }
 0x2b7   :  { %v655_v62 = vmax.f32 %v633_v56, 0.0  ;;  %v625_v63 = vadd.f32 %v624_v41, %v531_v61 }
 0x2b8   :  { %v853_v43 = vpop.f32.mrf.mxu0 }
 0x2b9   :  { %v646_v46 = vadd.f32 %v853_v43, %v556_v39  ;;  %v662_v4 = vpack.c.bf16 %v655_v62, %v654_v2  ;;  %v653_v5 = vmax.f32 %v625_v63, 0.0 }
 0x2ba   :  { %v637_v45 = vpop.f32.mrf.mxu0 }
 0x2bb   :  { %v658_v51 = vmax.f32 %v646_v46, 0.0  ;;  %v638_v52 = vadd.f32 %v637_v45, %v546_v44  ;;  %v661_v7 = vpack.c.bf16 %v653_v5, %v652_v6 }
 0x2bc   :  { %v854_v47 = vpop.f32.mrf.mxu0 }
 0x2bd   :  { %v649_v48 = vadd.f32 %v854_v47, %v561_v37  ;;  %v656_v60 = vmax.f32 %v638_v52, 0.0 }
 0x2be   :  { %v640_v50 = vpop.f32.mrf.mxu0 }
 0x2bf   :  { %v659_v53 = vmax.f32 %v649_v48, 0.0  ;;  %v641_v54 = vadd.f32 %v640_v50, %v551_v42 }
 0x2c1   :  { %v664_v57 = vpack.c.bf16 %v659_v53, %v658_v51  ;;  %v657_v58 = vmax.f32 %v641_v54, 0.0 }
 0x2c3   :  { %856 = vmatpush3.bf16.msra.mxu1 %v664_v57  ;;  %v663_v0 = vpack.c.bf16 %v657_v58, %v656_v60 }
 0x2c4   :  { %857 = vmatprep.subr.bf16.mxu1 %v913_v35 }
 0x2c7   :  { %858 = vmatpush3.bf16.msra.mxu1 %v663_v0 }
 0x2c8   :  { %859 = vmatprep.subr.bf16.mxu1 %v913_v35 }
 0x2cb   :  { %860 = vmatpush3.bf16.msra.mxu1 %v662_v4 }
 0x2cc   :  { %861 = vmatprep.subr.bf16.mxu1 %v913_v35 }
 0x2cf   :  { %862 = vmatpush3.bf16.msra.mxu1 %v661_v7 }
 0x2d2   :  { %864 = vmatmul.mubr.msk.bf16.vlgmr.msra.gmra.mxu1 %vm361_vm2, %v660_v8 }
 0x392   :  { %v712_v14 = vpop.f32.mrf.mxu1 }
 0x393   :  { %v713_v15 = vadd.f32 %v712_v14, %v674_v13 }
 0x394   :  { %v865_v16 = vpop.f32.mrf.mxu1 }
 0x395   :  { %719 = vst.msk [vmem:[#allocation3] sm:$0x1] %vm718_vm4, %v713_v15 }
 0x396   :  { %v715_v17 = vpop.f32.mrf.mxu1 }
 0x397   :  { %901 = shalt.err (!%p898_p4)
}
 0x398   :  { %729 = dma.vmem_to_hbm [thread:$0]  %s727_s11, 16, %s1156_s9, [#allocation4]   ;;  %v866_v18 = vpop.f32.mrf.mxu1 }
 0x399   :  { %910 = dma.done.wait [#allocation4], 16  }
 0x39a   :  { %911 = vsyncadd [#allocation4], 4294967280 }
 0x39b   :  { %733 = vsyncpa [#allocation4], 1 }

</bundles_post_ra>
